<compile_context>
chip_gen: v5e
topology: v5e:2x2
jax: 0.10.0
libtpu: 0.0.40
codegen_flags: <defaults>
</compile_context>

<pallas_src>
import functools
import math

import jax
import jax.numpy as jnp
from jax.experimental import pallas as pl
from jax.experimental.pallas import tpu as pltpu


def _round_up(x, m):
    return (x + m - 1) // m * m


def _pick_tk(D, tk_max):
    """Largest K tile that divides D exactly (reduction axis needs no zero pad).

    Returns None if no 128-aligned divisor of D that is <= tk_max exists.
    """
    if D <= tk_max:
        return D  # single K step; block == full dim (always a legal block dim)
    t = (tk_max // 128) * 128
    while t >= 128:
        if D % t == 0:
            return t
        t -= 128
    return None


def _linear_kernel_f32_out(x_ref, w_ref, b_ref, o_ref):
    # x_ref: (TM, TK)  w_ref: (TK, TN)  b_ref: (1, TN)  o_ref: (TM, TN) fp32.
    # o_ref's block index (i, j) is k-invariant -> the output tile stays
    # resident in VMEM across the K axis, so accumulate straight into it.
    k = pl.program_id(2)

    @pl.when(k == 0)
    def _():
        o_ref[...] = jnp.zeros_like(o_ref)

    o_ref[...] += jnp.dot(
        x_ref[...], w_ref[...], preferred_element_type=jnp.float32
    )

    @pl.when(k == pl.num_programs(2) - 1)
    def _():
        o_ref[...] += b_ref[...].astype(o_ref.dtype)


def _linear_kernel_acc(x_ref, w_ref, b_ref, o_ref, acc_ref):
    # Variant with an fp32 VMEM accumulator for non-fp32 outputs (bf16/fp8):
    # accumulating across K in the narrow output dtype would lose precision.
    k = pl.program_id(2)

    @pl.when(k == 0)
    def _():
        acc_ref[...] = jnp.zeros_like(acc_ref)

    acc_ref[...] += jnp.dot(
        x_ref[...], w_ref[...], preferred_element_type=jnp.float32
    )

    @pl.when(k == pl.num_programs(2) - 1)
    def _():
        o_ref[...] = (acc_ref[...] + b_ref[...].astype(jnp.float32)).astype(
            o_ref.dtype
        )


def prepare_params(weight, bias):
    """One-time preprocessing of the (constant) nn.Linear parameters.

    weight: [2*D, D] (PyTorch layout) -> returns w_t: [D, 2*D], b2d: [1, 2*D].
    Call once and reuse the results for every forward call so the transpose
    never lands on the per-call HBM path.  Callers may also cast the returned
    weight (and x) to bfloat16 before the kernel; accumulation stays fp32.
    """
    D2, D = weight.shape
    assert bias.shape == (D2,)
    w_t = jnp.asarray(weight).T          # [D, 2*D]
    b2d = jnp.asarray(bias).reshape(1, D2)
    return w_t, b2d


@functools.partial(jax.jit, static_argnames=("tm", "tn", "tk"))
def upsample_mlp_prepared(x, w_t, b2d, *, tm=512, tn=512, tk=1024):
    """Forward of UpsampleMLP with pre-transposed weight.

    x:   [..., D]
    w_t: [D, 2*D]   (from prepare_params)
    b2d: [1, 2*D]
    returns [..., 2*D] in x.dtype.
    """
    *lead, D = x.shape
    Dw, D2 = w_t.shape
    assert Dw == D, "prepared weight must be [D, 2*D] (see prepare_params)"
    assert b2d.shape == (1, D2)

    M = math.prod(lead) if lead else 1
    x2d = x.reshape(M, D)
    out_dtype = x.dtype

    in_item = jnp.dtype(x.dtype).itemsize
    w_item = jnp.dtype(w_t.dtype).itemsize
    out_item = jnp.dtype(out_dtype).itemsize
    b_item = jnp.dtype(b2d.dtype).itemsize

    # dtype-aware sublane quantum (fp32: 8, bf16: 16, int8/fp8: 32).  The 512
    # tile defaults are multiples of 32, so full tiles stay sublane-aligned
    # for every dtype.
    sub = {4: 8, 2: 16, 1: 32}.get(in_item, 8)

    # --- tile selection ------------------------------------------------------
    # M / N: partial trailing blocks are fine (OOB reads only feed rows/cols
    # that are discarded; OOB writes are masked), so no activation/output
    # padding and no post-slice.
    TM = tm if M > tm else M
    TN = tn if D2 > tn else D2

    # K: must be covered exactly (garbage in a K tail would corrupt every
    # output).  Prefer a TK that divides D; zero-pad only in the rare fallback.
    TK = _pick_tk(D, tk)
    if TK is None:
        TK = max((tk // 128) * 128, 128)
        Dp = _round_up(D, TK)
        # TODO(synk): this pad re-streams x (and the constant weight) once per
        # call; only hit when D has no 128-aligned divisor <= tk.
        x2d = jnp.pad(x2d, ((0, 0), (0, Dp - D)))
        w2d = jnp.pad(w_t, ((0, Dp - D), (0, 0)))
    else:
        Dp = D
        w2d = w_t

    # Megacore guard (v7x has 2 TensorCores sharded over the parallel axes):
    # make sure at least one parallel axis has >= 2 blocks when it can.
    if pl.cdiv(M, TM) == 1 and pl.cdiv(D2, TN) == 1:
        if D2 >= 256:
            TN = _round_up(pl.cdiv(D2, 2), 128)
        elif M >= 2 * sub:
            TM = _round_up(pl.cdiv(M, 2), sub)

    grid = (pl.cdiv(M, TM), pl.cdiv(D2, TN), Dp // TK)

    # fp32 outputs accumulate directly in the K-resident output block; other
    # dtypes use an fp32 VMEM scratch accumulator.
    if out_dtype == jnp.float32:
        kernel = _linear_kernel_f32_out
        scratch_shapes = ()
        acc_bytes = 0
    else:
        kernel = _linear_kernel_acc
        scratch_shapes = (pltpu.VMEM((TM, TN), jnp.float32),)
        acc_bytes = TM * TN * 4

    # Explicit VMEM budget for the double-buffered pipeline (+25% headroom for
    # (8,128) layout rounding), clamped to v7x's 64 MiB physical VMEM.
    vmem_bytes = (
        2 * TM * TK * in_item        # double-buffered x tiles
        + 2 * TK * TN * w_item       # double-buffered W tiles
        + 2 * TN * b_item            # double-buffered bias tiles
        + 2 * TM * TN * out_item     # double-buffered output tiles
        + acc_bytes
    )
    vmem_limit = int(min(max(vmem_bytes * 5 // 4 + (2 << 20), 24 << 20), 64 << 20))

    cost = pl.CostEstimate(
        flops=2 * M * Dp * D2,
        transcendentals=0,
        bytes_accessed=(
            M * Dp * in_item * grid[1]     # x re-streamed once per N tile
            + Dp * D2 * w_item * grid[0]   # W re-streamed once per M tile
            + D2 * b_item * grid[0]
            + M * D2 * out_item            # output written once
        ),
    )

    out = pl.pallas_call(
        kernel,
        out_shape=jax.ShapeDtypeStruct((M, D2), out_dtype),
        grid_spec=pltpu.PrefetchScalarGridSpec(
            num_scalar_prefetch=0,
            grid=grid,
            in_specs=[
                pl.BlockSpec((TM, TK), lambda i, j, k: (i, k)),  # x tile
                pl.BlockSpec((TK, TN), lambda i, j, k: (k, j)),  # W tile (pre-T)
                pl.BlockSpec((1, TN), lambda i, j, k: (0, j)),   # bias tile
            ],
            out_specs=pl.BlockSpec((TM, TN), lambda i, j, k: (i, j)),
            scratch_shapes=scratch_shapes,
        ),
        compiler_params=pltpu.CompilerParams(
            dimension_semantics=("parallel", "parallel", "arbitrary"),
            vmem_limit_bytes=vmem_limit,
        ),
        cost_estimate=cost,
    )(x2d, w2d, b2d)

    return out.reshape(*lead, D2)


def upsample_mlp(x, weight, bias, *, tm=512, tn=512, tk=1024):
    """Convenience API matching nn.Linear(dim, 2*dim) with PyTorch weight layout.

    For repeated calls, call prepare_params() once and use
    upsample_mlp_prepared() so the weight transpose stays off the per-call path.
    """
    w_t, b2d = prepare_params(weight, bias)
    return upsample_mlp_prepared(x, w_t, b2d, tm=tm, tn=tn, tk=tk)


if __name__ == "__main__":
    B, T, D = 2, 8, 32  # batch, sequence, feature dim

    key = jax.random.PRNGKey(0)
    kx, kw, kb = jax.random.split(key, 3)

    x = jax.random.normal(kx, (B, T, D), dtype=jnp.float32)
    # Deterministic synthetic parameters (shapes follow nn.Linear(dim, 2*dim)).
    weight = jax.random.normal(kw, (2 * D, D), dtype=jnp.float32) * (
        1.0 / jnp.sqrt(D)
    )
    bias = jax.random.normal(kb, (2 * D,), dtype=jnp.float32) * 0.01

    # One-time parameter preparation (hoisted off the per-call path).
    w_t, b2d = prepare_params(weight, bias)

    y = upsample_mlp_prepared(x, w_t, b2d)
    jax.block_until_ready(y)

    # Reference check against plain JAX.
    y_ref = x @ weight.T + bias
    assert y.shape == (B, T, 2 * D)
    assert jnp.allclose(y, y_ref, atol=1e-5, rtol=1e-5)

    # Convenience wrapper (same compiled kernel) must agree as well.
    y2 = upsample_mlp(x, weight, bias)
    jax.block_until_ready(y2)
    assert jnp.allclose(y2, y_ref, atol=1e-5, rtol=1e-5)

    print("KERNEL_OK")
</pallas_src>

<mosaic_0001>
module attributes {stable_mosaic.version = 11 : i64} {
  func.func @_linear_kernel_f32_out(%arg0: i32, %arg1: i32, %arg2: i32, %arg3: memref<8x32xf32, #tpu.memory_space<vmem>>, %arg4: memref<32x64xf32, #tpu.memory_space<vmem>>, %arg5: memref<1x64xf32, #tpu.memory_space<vmem>>, %arg6: memref<8x64xf32, #tpu.memory_space<vmem>>) attributes {dimension_semantics = [#tpu.dimension_semantics<parallel>, #tpu.dimension_semantics<parallel>, #tpu.dimension_semantics<arbitrary>], iteration_bounds = array<i64: 2, 1, 1>, scalar_prefetch = 0 : i64, scratch_operands = 0 : i64, tpu.core_type = #tpu.core_type<tc>, window_params = [{transform_indices = @transform_0, window_bounds = array<i64: 8, 32>}, {transform_indices = @transform_1, window_bounds = array<i64: 32, 64>}, {transform_indices = @transform_2, window_bounds = array<i64: 1, 64>}, {transform_indices = @transform_3, window_bounds = array<i64: 8, 64>}]} {
    %c0_i32 = arith.constant 0 : i32
    %0 = arith.cmpi eq, %arg2, %c0_i32 : i32
    %1 = arith.extui %0 : i1 to i32
    %c0_i32_0 = arith.constant 0 : i32
    %2 = arith.cmpi ne, %1, %c0_i32_0 : i32
    scf.if %2 {
      %cst_10 = arith.constant 0.000000e+00 : f32
      %12 = vector.broadcast %cst_10 : f32 to vector<8x64xf32>
      %c0_11 = arith.constant 0 : index
      %c0_12 = arith.constant 0 : index
      %13 = vector.load %arg6[%c0_11, %c0_12] : memref<8x64xf32, #tpu.memory_space<vmem>>, vector<8x64xf32>
      tpu.vector_store %arg6[%c0_11, %c0_12], %12 {strides = array<i32>} : memref<8x64xf32, #tpu.memory_space<vmem>>, vector<8x64xf32>,
    } else {
    }
    %c0 = arith.constant 0 : index
    %c0_1 = arith.constant 0 : index
    %3 = vector.load %arg6[%c0, %c0_1] : memref<8x64xf32, #tpu.memory_space<vmem>>, vector<8x64xf32>
    %c0_2 = arith.constant 0 : index
    %c0_3 = arith.constant 0 : index
    %4 = vector.load %arg3[%c0_2, %c0_3] : memref<8x32xf32, #tpu.memory_space<vmem>>, vector<8x32xf32>
    %c0_4 = arith.constant 0 : index
    %c0_5 = arith.constant 0 : index
    %5 = vector.load %arg4[%c0_4, %c0_5] : memref<32x64xf32, #tpu.memory_space<vmem>>, vector<32x64xf32>
    %cst = arith.constant dense<0.000000e+00> : vector<8x64xf32>
    %6 = tpu.matmul %4, %5, %cst {dimension_numbers = #tpu.dot_dimension_numbers<[1], [0], [0], [1], [0, 0, 1, 1], [], []>} : vector<8x32xf32>, vector<32x64xf32>, vector<8x64xf32> -> vector<8x64xf32>
    %7 = arith.addf %3, %6 : vector<8x64xf32>
    %c0_6 = arith.constant 0 : index
    %c0_7 = arith.constant 0 : index
    %8 = vector.load %arg6[%c0_6, %c0_7] : memref<8x64xf32, #tpu.memory_space<vmem>>, vector<8x64xf32>
    tpu.vector_store %arg6[%c0_6, %c0_7], %7 {strides = array<i32>} : memref<8x64xf32, #tpu.memory_space<vmem>>, vector<8x64xf32>,
    %c0_i32_8 = arith.constant 0 : i32
    %9 = arith.cmpi eq, %arg2, %c0_i32_8 : i32
    %10 = arith.extui %9 : i1 to i32
    %c0_i32_9 = arith.constant 0 : i32
    %11 = arith.cmpi ne, %10, %c0_i32_9 : i32
    scf.if %11 {
      %c0_10 = arith.constant 0 : index
      %c0_11 = arith.constant 0 : index
      %12 = vector.load %arg6[%c0_10, %c0_11] : memref<8x64xf32, #tpu.memory_space<vmem>>, vector<8x64xf32>
      %c0_12 = arith.constant 0 : index
      %c0_13 = arith.constant 0 : index
      %13 = vector.load %arg5[%c0_12, %c0_13] : memref<1x64xf32, #tpu.memory_space<vmem>>, vector<1x64xf32>
      %14 = vector.broadcast %13 : vector<1x64xf32> to vector<8x64xf32>
      %15 = arith.addf %12, %14 : vector<8x64xf32>
      %c0_14 = arith.constant 0 : index
      %c0_15 = arith.constant 0 : index
      %16 = vector.load %arg6[%c0_14, %c0_15] : memref<8x64xf32, #tpu.memory_space<vmem>>, vector<8x64xf32>
      tpu.vector_store %arg6[%c0_14, %c0_15], %15 {strides = array<i32>} : memref<8x64xf32, #tpu.memory_space<vmem>>, vector<8x64xf32>,
    } else {
    }
    return
  }
  func.func @transform_0(%arg0: i32, %arg1: i32, %arg2: i32) -> (i32, i32) {
    %c0_i32 = arith.constant 0 : i32
    return %arg0, %arg2 : i32, i32
  }
  func.func @transform_1(%arg0: i32, %arg1: i32, %arg2: i32) -> (i32, i32) {
    %c0_i32 = arith.constant 0 : i32
    return %arg2, %arg1 : i32, i32
  }
  func.func @transform_2(%arg0: i32, %arg1: i32, %arg2: i32) -> (i32, i32) {
    %c0_i32 = arith.constant 0 : i32
    %c0_i32_0 = arith.constant 0 : i32
    return %c0_i32, %arg1 : i32, i32
  }
  func.func @transform_3(%arg0: i32, %arg1: i32, %arg2: i32) -> (i32, i32) {
    %c0_i32 = arith.constant 0 : i32
    return %arg0, %arg1 : i32, i32
  }
}

</mosaic_0001>

<bundles_post_ra>
// kernel: upsample_mlp_prepared.1
= control target key start
LH: loop header
LB: loop body
LE: loop exit
PB: predicated region body
PF: predicated region fallthrough
CT: control target
= control target key end

     0   :  { %8 = vsyncpa [#allocation3], 0  ;;  %s845_s0 = inlined_call_operand.hbm [shape: f32[16,32], index: 0, kind: input, shape index: {}]   ;;  %s846_s1 = inlined_call_operand.hbm [shape: f32[32,64], index: 1, kind: input, shape index: {}]   ;;  %s847_s2 = inlined_call_operand.vmem [shape: f32[1,64], index: 2, kind: input, shape index: {}]   ;;  %s848_s3 = inlined_call_operand.hbm [shape: f32[16,64], index: 3, kind: output, shape index: {}]  }
   0x1   :  { %10 = vsyncpa [#allocation3 + $0x1], 0 }
   0x2   :  { %11 = vsyncpa [#allocation6], 0 }
   0x3   :  { %12 = vsyncpa [#allocation4], 0 }
   0x4   :  { %14 = vsyncpa [#allocation4 + $0x1], 0  ;;  %s696_s12 = smov 0   ;;  %s698_s13 = smov 0  }
   0x5   :  { %s700_s14 = smov 0   ;;  %s702_s15 = smov 0  }
   0x6   :  { %s704_s16 = smov 0   ;;  %s706_s17 = smov 0  }
   0x7 LB: > { %s430_s18 = sadd.s32 4294967295, %s670_s17   ;;  %p432_p0 = scmp.ge.s32.totalorder %s670_s17, 1  ;;  %s670_s17 = sphi %s706_s17, %s20_s17   ;;  %s666_s16 = sphi %s704_s16, %s859_s16   ;;  %s662_s15 = sphi %s702_s15, %s858_s15   ;;  %s658_s14 = sphi %s700_s14, %s857_s14   ;;  %s654_s13 = sphi %s698_s13, %s856_s13   ;;  %s650_s12 = sphi %s696_s12, %s855_s12  }
   0x8   : > { %p728_p1 = scmp.eq.s32.totalorder %s430_s18, 0  ;;  %p154_p2 = scmp.lt.s32.totalorder %s670_s17, 3 }
   0x9   : > { %s169_s22 = sshll.u32 %s846_s1, 4  ;;  %s672_s24 = smov [#allocation5]   ;;  %s170_s22 = int_to_ptr.hbm [resolvable:$true] %s169_s22 }
   0xa   : > { %p736_p3 = pnand %p432_p0, %p154_p2  ;;  %s171_s25 = sshll.u32 %s672_s24, 4  ;;  %s172_s25 = int_to_ptr.vmem [resolvable:$true] %s171_s25 }
   0xb   : > { %p435_p6 = scmp.ge.s32.totalorder %s670_s17, 2  ;;  %s673_s26 = smov 128  }
   0xc   : > { %p455_p4 = pneg %p736_p3  ;;  %s674_s27 = smov 8  }
   0xd   : > { %s431_s28 = sadd.s32 4294967294, %s670_s17   ;;  %s39_s29 = sadd.s32 1, %s666_s16 }
   0xe   : > { %p456_p5 = pnand %p455_p4, %p728_p1  ;;  %s48_s30 = sadd.s32 1, %s658_s14 }
   0xf   : > { %p41_p7 = scmp.ge.s32.totalorder %s39_s29, 2  ;;  %p55_p8 = scmp.ne.s32.totalorder %s658_s14, %s654_s13 }
  0x10   : > { %458 = dma.hbm_to_vmem [thread:$0]  (!%p456_p5), %s170_s22, 512, %s172_s25, [#allocation6], %s673_s26, %s673_s26, %s674_s27  }
  0x11   : > { %p56_p9 = scmp.eq.s32.totalorder %s670_s17, 0  ;;  %p61_p10 = scmp.ne.s32.totalorder %s654_s13, %s650_s12 }
  0x12   : > { %s861_s29 = smov (%p41_p7, %s39_s29), 0  ;;  %p141_p13 = scmp.eq.s32.totalorder %s430_s18, 1 }
  0x13   : > { %p755_p11 = por %p56_p9, %p55_p8  ;;  %p761_p12 = por %p728_p1, %p61_p10 }
  0x14   : > { %s43_s6 = ssub.s32 %s666_s16, %s861_s29  ;;  %p147_p2 = scmp.eq.s32.totalorder %s431_s28, 1 }
  0x15   : > { %p46_p0 = scmp.eq.s32.totalorder %s43_s6, 0  ;;  %p767_p4 = por %p141_p13, %p55_p8 }
  0x16   : > { %p468_p5 = scmp.lt.s32.totalorder %s670_s17, 2  ;;  %p775_p7 = por %p147_p2, %p61_p10 }
  0x17   : > { %s773_s8 = scalar_select %p46_p0, %s658_s14, %s48_s30  }
  0x18   : > { %s191_s10 = sand.u32 1, %s658_s14   ;;  %s437_s20 = sshll.u32 %s666_s16, 3 }
  0x19   : > { %s436_s11 = sshll.u32 %s191_s10, 3  ;;  %s200_s18 = scalar_lea.hbm %s845_s0, %s437_s20 }
  0x1a   : > { %s195_s24 = scalar_lea.vmem [#allocation2], %s436_s11  ;;  %s202_s26 = sshll.u32 %s200_s18, 4  ;;  %s203_s26 = int_to_ptr.hbm [resolvable:$true] %s202_s26 }
  0x1b   : > { %s204_s25 = sshll.u32 %s195_s24, 4  ;;  %p460_p8 = pnand %p468_p5, %p755_p11  ;;  %s205_s25 = int_to_ptr.vmem [resolvable:$true] %s204_s25 }
  0x1c   : > { %s192_s27 = scalar_lea.sflag [#allocation3], %s191_s10  ;;  %213 = sbr.rel (%p736_p3) target bundleno = 185 (0xb9), region = 32 }
  0x1d   : > { %462 = dma.hbm_to_vmem [thread:$0]  (!%p460_p8), %s203_s26, 128, %s205_s25, %s192_s27  }
  0x1e   : > { %s789_s28 = sand.u32 (!%p736_p3), 1, %s654_s13  }
  0x1f   : > { %s439_s30 = sshll.u32 (!%p736_p3), %s789_s28, 3  ;;  %s216_s6 = scalar_lea.sflag (!%p736_p3), [#allocation3], %s789_s28 }
  0x20   : > { %s219_s11 = scalar_lea.vmem (!%p736_p3), [#allocation2], %s439_s30 }
  0x21   : > { %637 = dma.done.wait (%p761_p12), %s216_s6, 128  }
  0x22   : > { %639 = vsyncadd (%p761_p12), %s216_s6, 4294967168 }
  0x23   : > { %641 = dma.done.wait (%p728_p1), [#allocation6], 512  }
  0x24   : > { %643 = vsyncadd (%p728_p1), [#allocation6], 4294966784  ;;  %vm259_vm0 = vcmask 523264   ;;  %s250_s23 = scalar_lea.vmem [#allocation7], %s439_s30  ;;  %v675_v0 = vmov 0.0   ;;  %v266_v1 = vld [vmem:[#allocation5 + $0x18] sm:$0xff] }
  0x25   : > { %260 = vst.msk [vmem:[%s250_s23] sm:$0xff] %vm259_vm0, %v675_v0  ;;  %v265_v2 = vld [vmem:[#allocation5 + $0x10] sm:$0xff]  ;;  %283 = vmatpush.msra.mxu0 %v266_v1  ;;  %v264_v3 = vld [vmem:[#allocation5 + $0x8] sm:$0xff]  ;;  %v263_v4 = vld [vmem:[#allocation5] sm:$0xff]  ;;  %vm267_vm1 = vcmask 261120   ;;  %s444_s19 = sshll.u32 %s662_s15, 3 }
  0x26   : > { %v262_v5 = vld [vmem:[%s219_s11] sm:$0xff]  ;;  %s316_s10 = scalar_lea.hbm %s848_s3, %s444_s19  ;;  %s318_s22 = sshll.u32 %s250_s23, 4  ;;  %s319_s22 = int_to_ptr.vmem [resolvable:$true] %s318_s22 }
  0x27   : > { %284 = vmatpush.msra.mxu0 %v265_v2  ;;  %v523_v9 = vld [vmem:[%s847_s2] ss:$0 sm:$0xff]  ;;  %s320_s18 = sshll.u32 %s316_s10, 4  ;;  %s305_s15 = scalar_lea.sflag [#allocation4], %s789_s28  ;;  %s321_s18 = int_to_ptr.hbm [resolvable:$true] %s320_s18 }
  0x28   : > { %s598_s24 = sshra.s32 %s321_s18, 4  ;;  %s604_s30 = scalar_lea.hbm %s848_s3, 16  ;;  %s599_s24 = int_to_ptr.hbm [resolvable:$true] %s598_s24 }
  0x29   : > { %285 = vmatpush.msra.mxu0 %v264_v3  ;;  %s600_s25 = scalar_lea.hbm %s599_s24, 8  ;;  %p605_p10 = scmp.lt.s32.totalorder %s599_s24, %s848_s3 }
  0x2a   : > { %p601_p1 = scmp.ne.s32.totalorder %s599_s24, %s600_s25  ;;  %p606_p11 = scmp.lt.s32.totalorder %s604_s30, %s600_s25 }
  0x2b   : > { %286 = vmatpush.msra.mxu0 %v263_v4 }
  0x2c   : > { %442 = vmatmul.msk.f32.vlgmr.msra.gmra.mxu0 %vm267_vm1, %v262_v5  ;;  %v261_v6 = vld [vmem:[%s250_s23] sm:$0xff]  ;;  %p602_p3 = pnand %p601_p1, %p767_p4  ;;  %p607_p12 = por %p606_p11, %p605_p10 }
  0x2e   : > { %p603_p9 = pneg %p602_p3 }
  0x30   : > { %p608_p13 = pnand %p607_p12, %p603_p9 }
  0xa9   : > { %v288_v7 = vpop.f32.mrf.mxu0 }
  0xaa   : > { %v291_v8 = vadd.f32 %v288_v7, %v261_v6 }
  0xac   : > { %293 = vst.msk [vmem:[%s250_s23] sm:$0xff] %vm259_vm0, %v291_v8 }
  0xb3   : > { %v297_v10 = vld [vmem:[%s250_s23] sm:$0xff] }
  0xb4   : > { %v302_v11 = vadd.f32 %v523_v9, %v297_v10 }
  0xb6   : > { %303 = vst.msk [vmem:[%s250_s23] sm:$0xff] %vm259_vm0, %v302_v11 }
  0xb7   : > { %611 = shalt.err (!%p608_p13)
}
  0xb8   : > { %453 = dma.vmem_to_hbm [thread:$0]  (%p767_p4), %s319_s22, 128, %s321_s18, %s305_s15  }
  0xb9 PF: > { %s332_s28 = sand.u32 1, %s650_s12   ;;  %p464_p0 = pnand %p435_p6, %p775_p7 }
  0xba   : > { %s333_s23 = scalar_lea.sflag [#allocation4], %s332_s28 }
  0xbb   : > { %p465_p2 = pneg %p464_p0 }
  0xbd   : > { %645 = dma.done.wait (%p465_p2), %s333_s23, 128  }
  0xbe   : > { %647 = vsyncadd (%p465_p2), %s333_s23, 4294967168  ;;  %s20_s17 = sadd.s32 1, %s670_s17   ;;  %s855_s12 = smov %s654_s13 }
  0xbf   : > { %p17_p5 = scmp.ge.s32.totalorder %s20_s17, 4   ;;  %s856_s13 = smov %s658_s14 }
  0xc0   : > { %s857_s14 = smov %s773_s8  ;;  %s858_s15 = smov %s666_s16 }
  0xc1   : > { %s859_s16 = smov %s861_s29  ;;  %19 = sbr.rel (!%p17_p5) target bundleno = 7 (0x7), region = 93 }
  0xc6   :  { %339 = vsyncpa [#allocation3], 1 }
  0xc7   :  { %341 = vsyncpa [#allocation3 + $0x1], 1 }
  0xc8   :  { %342 = vsyncpa [#allocation6], 1 }
  0xc9   :  { %343 = vsyncpa [#allocation4], 1 }
  0xca   :  { %345 = vsyncpa [#allocation4 + $0x1], 1 }

</bundles_post_ra>
